<compile_context>
chip_gen: v7x
topology: tpu7x:2x2x1
jax: 0.10.0
libtpu: 0.0.40
codegen_flags: <defaults>
</compile_context>

<pallas_src>
import functools

import jax
import jax.numpy as jnp
from jax.experimental import pallas as pl
from jax.experimental.pallas import tpu as pltpu

LOG2E = 1.4426950408889634


def _round_up(x, m):
    return ((x + m - 1) // m) * m


def _cdiv(a, b):
    return -(-a // b)


def _vmem_budget_bytes():
    """Generation-aware (planning budget, vmem_limit cap) in bytes."""
    try:
        cap = int(pltpu.get_tpu_info().vmem_capacity_bytes)
    except Exception:          # not on a TPU / interpret mode: be conservative (v7x-like)
        cap = 64 << 20
    if cap >= (96 << 20):      # v5e / v6e: 128 MiB physical VMEM
        return 80 << 20, 100 << 20
    return 40 << 20, 48 << 20  # v7x: 64 MiB physical VMEM


def _plan_tiles(B, H, Sq, Sk, D, in_dtype, out_dtype):
    """Pick (th, tq, tk, vmem_limit_bytes)."""
    in_bytes = jnp.dtype(in_dtype).itemsize
    out_bytes = jnp.dtype(out_dtype).itemsize
    sublane = {4: 8, 2: 16, 1: 32}.get(in_bytes, 8)
    budget, limit_cap = _vmem_budget_bytes()

    # tk is the lane dim of the score tiles and the MXU N dim: keep it a multiple
    # of 128 (the mask_k path handles padded columns).  tq is the sublane dim:
    # round to the dtype packing multiple and grow it first, since K/V blocks are
    # re-fetched from HBM for every qi step (their index_map ignores qi).
    tk = min(512, _round_up(Sk, 128))
    tq = min(512, _round_up(Sq, sublane))

    def step_bytes(th, tq_, tk_):
        inputs = 2 * (th * tq_ * D + 2 * th * tk_ * D) * in_bytes  # q,k,v double-buffered
        output = 2 * th * tq_ * D * out_bytes                      # out double-buffered
        scratch = 4 * (th * tq_ * D + 2 * th * tq_) + th * tq_ * D * in_bytes  # acc+m+l+qs
        scores = 2 * 4 * th * tq_ * tk_                            # s and p f32 tiles
        return inputs + output + scratch + scores

    # Fallback for very large D: shrink tk, then tq, so a single head always fits.
    while step_bytes(1, tq, tk) > budget and tk > 128:
        tk = max(128, _round_up(tk // 2, 128))
    while step_bytes(1, tq, tk) > budget and tq > sublane:
        tq = max(sublane, _round_up(tq // 2, sublane))

    # Largest head batch (divisor of H) whose working set fits the budget.
    th = 1
    for cand in range(H, 0, -1):
        if H % cand == 0 and step_bytes(cand, tq, tk) <= budget:
            th = cand
            break

    # Keep >=2 "parallel" grid steps so v7x's second TensorCore has work
    # (costs only ~0.35us extra grid overhead on single-core v5e/v6e).
    while th > 1 and B * (H // th) * _cdiv(Sq, tq) < 2:
        th = max(d for d in range(1, th) if H % d == 0)

    vmem_limit = int(min(max(2 * step_bytes(th, tq, tk), 16 << 20), limit_cap))
    return th, tq, tk, vmem_limit


def _flash_attn_kernel(scale_ref, q_ref, k_ref, v_ref, o_ref,
                       qs_sc, m_sc, l_sc, acc_sc, *, sk, mask_k, mm_dtype):
    # scale_ref: (th, 1, 1) f32 = log2(e)/temperature per head
    # q_ref: (th, tq, D)   k_ref / v_ref: (th, tk, D)   o_ref: (th, tq, D)
    # qs_sc: (th, tq, D) mm_dtype (ki-invariant scaled Q)
    # m_sc/l_sc: (th, tq, 1) f32   acc_sc: (th, tq, D) f32
    ki = pl.program_id(3)
    NEG = -1e30

    @pl.when(ki == 0)
    def _():
        # Hoist the ki-invariant Q rescale out of the K/V loop; log2(e) is folded
        # into the scale so the softmax uses exp2 directly.
        qs_sc[...] = (q_ref[...].astype(jnp.float32) * scale_ref[...]).astype(qs_sc.dtype)
        m_sc[...] = jnp.full(m_sc.shape, NEG, m_sc.dtype)
        l_sc[...] = jnp.zeros(l_sc.shape, l_sc.dtype)
        acc_sc[...] = jnp.zeros(acc_sc.shape, acc_sc.dtype)

    q = qs_sc[...]
    k = k_ref[...].astype(mm_dtype)

    # s[h, q, k] = sum_d q[h, q, d] * k[h, k, d]   (already scaled by log2(e)/temp)
    # Contract the last dims directly (no explicit K transpose / XLU traffic).
    s = jax.lax.dot_general(
        q, k, (((2,), (2,)), ((0,), (0,))),
        preferred_element_type=jnp.float32)  # (th, tq, tk) f32

    if mask_k:  # static: only emitted when Sk was padded up to the lane multiple
        tk = k_ref.shape[1]
        col = ki * tk + jax.lax.broadcasted_iota(jnp.int32, s.shape, 2)
        s = jnp.where(col < sk, s, NEG)

    # Online (flash) softmax update, base-2.
    m_prev = m_sc[...]
    m_new = jnp.maximum(m_prev, jnp.max(s, axis=-1, keepdims=True))
    alpha = jnp.exp2(m_prev - m_new)
    p = jnp.exp2(s - m_new)
    l_sc[...] = alpha * l_sc[...] + jnp.sum(p, axis=-1, keepdims=True)
    pv = jax.lax.dot_general(
        p.astype(mm_dtype), v_ref[...].astype(mm_dtype),
        (((2,), (1,)), ((0,), (0,))),
        preferred_element_type=jnp.float32)  # (th, tq, D) f32
    acc_sc[...] = alpha * acc_sc[...] + pv
    m_sc[...] = m_new

    @pl.when(ki == pl.num_programs(3) - 1)
    def _():
        # TODO(synk): torch.nn.Dropout(p=1) in train() would zero the output; we
        # implement eval-mode semantics where dropout is the identity.
        # Exact divide (once per Q tile): the approx EUP reciprocal previously
        # cost ~1e-2 of accuracy for a negligible saving.
        o_ref[...] = (acc_sc[...] / l_sc[...]).astype(o_ref.dtype)


def attention_pallas(query, key, value, temperature, *, mxu_dtype=None):
    """query: (B,H,Sq,D), key/value: (B,H,Sk,D), temperature: (1,num_heads,1,1).

    mxu_dtype: optional matmul-operand dtype (e.g. jnp.bfloat16) to downcast f32
    inputs for full MXU rate.  Default keeps the input dtype so f32 inputs stay
    at f32 accuracy; bf16 inputs already run the MXU at full rate.
    """
    B, H, Sq, D = query.shape
    Sk = key.shape[2]
    out_dtype = query.dtype
    mm_dtype = jnp.dtype(mxu_dtype) if mxu_dtype is not None else jnp.dtype(query.dtype)

    # Per-head log2(e)/temperature (broadcast a size-1 head dim if needed).
    # NOTE: like the PyTorch reference, temperature == 0 yields inf here.
    temp_per_head = jnp.broadcast_to(temperature.reshape(-1), (H,)).astype(jnp.float32)
    scale = (LOG2E / temp_per_head).reshape(H, 1, 1)

    th, tq, tk, vmem_limit = _plan_tiles(B, H, Sq, Sk, D, query.dtype, out_dtype)

    Sq_pad = _round_up(Sq, tq)
    Sk_pad = _round_up(Sk, tk)
    q_p = query if Sq_pad == Sq else jnp.pad(
        query, ((0, 0), (0, 0), (0, Sq_pad - Sq), (0, 0)))
    k_p = key if Sk_pad == Sk else jnp.pad(
        key, ((0, 0), (0, 0), (0, Sk_pad - Sk), (0, 0)))
    v_p = value if Sk_pad == Sk else jnp.pad(
        value, ((0, 0), (0, 0), (0, Sk_pad - Sk), (0, 0)))

    grid = (B, H // th, Sq_pad // tq, Sk_pad // tk)
    sqz = pl.Squeezed()
    kernel = functools.partial(_flash_attn_kernel, sk=Sk, mask_k=(Sk_pad != Sk),
                               mm_dtype=mm_dtype)

    out = pl.pallas_call(
        kernel,
        out_shape=jax.ShapeDtypeStruct((B, H, Sq_pad, D), out_dtype),
        grid_spec=pltpu.PrefetchScalarGridSpec(
            num_scalar_prefetch=0,
            grid=grid,
            in_specs=[
                pl.BlockSpec((th, 1, 1), lambda b, hi, qi, ki: (hi, 0, 0)),            # scale
                pl.BlockSpec((sqz, th, tq, D), lambda b, hi, qi, ki: (b, hi, qi, 0)),  # Q
                pl.BlockSpec((sqz, th, tk, D), lambda b, hi, qi, ki: (b, hi, ki, 0)),  # K
                pl.BlockSpec((sqz, th, tk, D), lambda b, hi, qi, ki: (b, hi, ki, 0)),  # V
            ],
            out_specs=pl.BlockSpec((sqz, th, tq, D), lambda b, hi, qi, ki: (b, hi, qi, 0)),
            scratch_shapes=[
                pltpu.VMEM((th, tq, D), mm_dtype),      # scaled Q (ki-invariant)
                pltpu.VMEM((th, tq, 1), jnp.float32),   # m (running max, base-2)
                pltpu.VMEM((th, tq, 1), jnp.float32),   # l (running denominator)
                pltpu.VMEM((th, tq, D), jnp.float32),   # acc (running numerator)
            ],
        ),
        compiler_params=pltpu.CompilerParams(
            dimension_semantics=("parallel", "parallel", "parallel", "arbitrary"),
            vmem_limit_bytes=vmem_limit,
        ),
    )(scale, q_p, k_p, v_p)

    return out[:, :, :Sq, :]


def reference(query, key, value, temperature):
    qk = jnp.einsum("bhqd,bhkd->bhqk", query, key,
                    precision=jax.lax.Precision.HIGHEST)
    scaled = qk * (1.0 / temperature)
    p = jax.nn.softmax(scaled, axis=-1)
    return jnp.einsum("bhqk,bhkd->bhqd", p, value,
                      precision=jax.lax.Precision.HIGHEST)


if __name__ == "__main__":
    # Module construction: Model(num_embeddings, embedding_dim=1, num_heads=1, dropout_p=1)
    embedding_dim = 1
    num_heads = 1
    # temperature = ones(1, num_heads, 1, 1) * (embedding_dim // num_heads) = 1.0
    temperature = jnp.ones((1, num_heads, 1, 1), jnp.float32) * float(
        embedding_dim // num_heads)

    k0, k1, k2 = jax.random.split(jax.random.PRNGKey(0), 3)
    query = jax.random.normal(k0, (1, 8, 5, 32), jnp.float32)
    key = jax.random.normal(k1, (1, 8, 7, 32), jnp.float32)
    value = jax.random.normal(k2, (1, 8, 7, 32), jnp.float32)

    out = attention_pallas(query, key, value, temperature)
    out = jax.block_until_ready(out)

    ref = reference(query, key, value, temperature)
    assert out.shape == (1, 8, 5, 32), out.shape
    max_err = float(jnp.max(jnp.abs(out - ref)))
    assert jnp.allclose(out, ref, atol=2e-3, rtol=2e-3), max_err
    print("KERNEL_OK")
</pallas_src>

<mosaic_0001>
module attributes {stable_mosaic.version = 11 : i64} {
  func.func @_flash_attn_kernel(%arg0: i32, %arg1: i32, %arg2: i32, %arg3: i32, %arg4: memref<4x1x1xf32, #tpu.memory_space<vmem>>, %arg5: memref<1x4x8x32xf32, #tpu.memory_space<vmem>>, %arg6: memref<1x4x128x32xf32, #tpu.memory_space<vmem>>, %arg7: memref<1x4x128x32xf32, #tpu.memory_space<vmem>>, %arg8: memref<1x4x8x32xf32, #tpu.memory_space<vmem>>, %arg9: memref<4x8x32xf32, #tpu.memory_space<vmem>>, %arg10: memref<4x8x1xf32, #tpu.memory_space<vmem>>, %arg11: memref<4x8x1xf32, #tpu.memory_space<vmem>>, %arg12: memref<4x8x32xf32, #tpu.memory_space<vmem>>) attributes {dimension_semantics = [#tpu.dimension_semantics<parallel>, #tpu.dimension_semantics<parallel>, #tpu.dimension_semantics<parallel>, #tpu.dimension_semantics<arbitrary>], iteration_bounds = array<i64: 1, 2, 1, 1>, scalar_prefetch = 0 : i64, scratch_operands = 4 : i64, tpu.core_type = #tpu.core_type<tc>, window_params = [{transform_indices = @transform_0, window_bounds = array<i64: 4, 1, 1>}, {transform_indices = @transform_1, window_bounds = array<i64: 1, 4, 8, 32>}, {transform_indices = @transform_2, window_bounds = array<i64: 1, 4, 128, 32>}, {transform_indices = @transform_3, window_bounds = array<i64: 1, 4, 128, 32>}, {transform_indices = @transform_4, window_bounds = array<i64: 1, 4, 8, 32>}]} {
    %c0_i32 = arith.constant 0 : i32
    %0 = arith.cmpi eq, %arg3, %c0_i32 : i32
    %1 = arith.extui %0 : i1 to i32
    %c0_i32_0 = arith.constant 0 : i32
    %2 = arith.cmpi ne, %1, %c0_i32_0 : i32
    scf.if %2 {
      %c0_35 = arith.constant 0 : index
      %c0_36 = arith.constant 0 : index
      %c0_37 = arith.constant 0 : index
      %c0_38 = arith.constant 0 : index
      %42 = vector.load %arg5[%c0_35, %c0_36, %c0_37, %c0_38] : memref<1x4x8x32xf32, #tpu.memory_space<vmem>>, vector<1x4x8x32xf32>
      %43 = vector.shape_cast %42 : vector<1x4x8x32xf32> to vector<4x8x32xf32>
      %c0_39 = arith.constant 0 : index
      %c0_40 = arith.constant 0 : index
      %c0_41 = arith.constant 0 : index
      %44 = vector.load %arg4[%c0_39, %c0_40, %c0_41] : memref<4x1x1xf32, #tpu.memory_space<vmem>>, vector<4x1x1xf32>
      %45 = vector.broadcast %44 : vector<4x1x1xf32> to vector<4x8x32xf32>
      %46 = arith.mulf %43, %45 : vector<4x8x32xf32>
      %c0_42 = arith.constant 0 : index
      %c0_43 = arith.constant 0 : index
      %c0_44 = arith.constant 0 : index
      %47 = vector.load %arg9[%c0_42, %c0_43, %c0_44] : memref<4x8x32xf32, #tpu.memory_space<vmem>>, vector<4x8x32xf32>
      tpu.vector_store %arg9[%c0_42, %c0_43, %c0_44], %46 {strides = array<i32>} : memref<4x8x32xf32, #tpu.memory_space<vmem>>, vector<4x8x32xf32>,
      %cst_45 = arith.constant -1.000000e+30 : f32
      %48 = vector.broadcast %cst_45 : f32 to vector<4x8x1xf32>
      %c0_46 = arith.constant 0 : index
      %c0_47 = arith.constant 0 : index
      %c0_48 = arith.constant 0 : index
      %49 = vector.load %arg10[%c0_46, %c0_47, %c0_48] : memref<4x8x1xf32, #tpu.memory_space<vmem>>, vector<4x8x1xf32>
      tpu.vector_store %arg10[%c0_46, %c0_47, %c0_48], %48 {strides = array<i32>} : memref<4x8x1xf32, #tpu.memory_space<vmem>>, vector<4x8x1xf32>,
      %cst_49 = arith.constant 0.000000e+00 : f32
      %50 = vector.broadcast %cst_49 : f32 to vector<4x8x1xf32>
      %c0_50 = arith.constant 0 : index
      %c0_51 = arith.constant 0 : index
      %c0_52 = arith.constant 0 : index
      %51 = vector.load %arg11[%c0_50, %c0_51, %c0_52] : memref<4x8x1xf32, #tpu.memory_space<vmem>>, vector<4x8x1xf32>
      tpu.vector_store %arg11[%c0_50, %c0_51, %c0_52], %50 {strides = array<i32>} : memref<4x8x1xf32, #tpu.memory_space<vmem>>, vector<4x8x1xf32>,
      %cst_53 = arith.constant 0.000000e+00 : f32
      %52 = vector.broadcast %cst_53 : f32 to vector<4x8x32xf32>
      %c0_54 = arith.constant 0 : index
      %c0_55 = arith.constant 0 : index
      %c0_56 = arith.constant 0 : index
      %53 = vector.load %arg12[%c0_54, %c0_55, %c0_56] : memref<4x8x32xf32, #tpu.memory_space<vmem>>, vector<4x8x32xf32>
      tpu.vector_store %arg12[%c0_54, %c0_55, %c0_56], %52 {strides = array<i32>} : memref<4x8x32xf32, #tpu.memory_space<vmem>>, vector<4x8x32xf32>,
    } else {
    }
    %c0 = arith.constant 0 : index
    %c0_1 = arith.constant 0 : index
    %c0_2 = arith.constant 0 : index
    %3 = vector.load %arg9[%c0, %c0_1, %c0_2] : memref<4x8x32xf32, #tpu.memory_space<vmem>>, vector<4x8x32xf32>
    %c0_3 = arith.constant 0 : index
    %c0_4 = arith.constant 0 : index
    %c0_5 = arith.constant 0 : index
    %c0_6 = arith.constant 0 : index
    %4 = vector.load %arg6[%c0_3, %c0_4, %c0_5, %c0_6] : memref<1x4x128x32xf32, #tpu.memory_space<vmem>>, vector<1x4x128x32xf32>
    %5 = vector.shape_cast %4 : vector<1x4x128x32xf32> to vector<4x128x32xf32>
    %cst = arith.constant dense<0.000000e+00> : vector<4x8x128xf32>
    %6 = tpu.matmul %3, %5, %cst {dimension_numbers = #tpu.dot_dimension_numbers<[2], [2], [1], [1], [0, 0, 0, 1, 1, 1], [0], [0]>} : vector<4x8x32xf32>, vector<4x128x32xf32>, vector<4x8x128xf32> -> vector<4x8x128xf32>
    %c128_i32 = arith.constant 128 : i32
    %7 = arith.muli %arg3, %c128_i32 : i32
    %8 = tpu.iota {dimensions = array<i32: 2>} : vector<4x8x128xi32>
    %9 = vector.broadcast %7 : i32 to vector<4x8x128xi32>
    %10 = arith.addi %9, %8 : vector<4x8x128xi32>
    %c7_i32 = arith.constant 7 : i32
    %11 = vector.broadcast %c7_i32 : i32 to vector<4x8x128xi32>
    %12 = arith.cmpi slt, %10, %11 : vector<4x8x128xi32>
    %cst_7 = arith.constant -1.000000e+30 : f32
    %13 = vector.broadcast %cst_7 : f32 to vector<4x8x128xf32>
    %14 = arith.select %12, %6, %13 : vector<4x8x128xi1>, vector<4x8x128xf32>
    %c0_8 = arith.constant 0 : index
    %c0_9 = arith.constant 0 : index
    %c0_10 = arith.constant 0 : index
    %15 = vector.load %arg10[%c0_8, %c0_9, %c0_10] : memref<4x8x1xf32, #tpu.memory_space<vmem>>, vector<4x8x1xf32>
    %cst_11 = arith.constant dense<0xFF800000> : vector<4x8xf32>
    %16 = vector.multi_reduction <maximumf>, %14, %cst_11 [2] : vector<4x8x128xf32> to vector<4x8xf32>
    %17 = vector.shape_cast %16 : vector<4x8xf32> to vector<4x8x1xf32>
    %18 = arith.maximumf %15, %17 : vector<4x8x1xf32>
    %19 = arith.subf %15, %18 : vector<4x8x1xf32>
    %20 = math.exp2 %19 : vector<4x8x1xf32>
    %21 = vector.broadcast %18 : vector<4x8x1xf32> to vector<4x8x128xf32>
    %22 = arith.subf %14, %21 : vector<4x8x128xf32>
    %23 = math.exp2 %22 : vector<4x8x128xf32>
    %c0_12 = arith.constant 0 : index
    %c0_13 = arith.constant 0 : index
    %c0_14 = arith.constant 0 : index
    %24 = vector.load %arg11[%c0_12, %c0_13, %c0_14] : memref<4x8x1xf32, #tpu.memory_space<vmem>>, vector<4x8x1xf32>
    %25 = arith.mulf %20, %24 : vector<4x8x1xf32>
    %cst_15 = arith.constant dense<0.000000e+00> : vector<4x8xf32>
    %26 = vector.multi_reduction <add>, %23, %cst_15 [2] : vector<4x8x128xf32> to vector<4x8xf32>
    %27 = vector.shape_cast %26 : vector<4x8xf32> to vector<4x8x1xf32>
    %28 = arith.addf %25, %27 : vector<4x8x1xf32>
    %c0_16 = arith.constant 0 : index
    %c0_17 = arith.constant 0 : index
    %c0_18 = arith.constant 0 : index
    %29 = vector.load %arg11[%c0_16, %c0_17, %c0_18] : memref<4x8x1xf32, #tpu.memory_space<vmem>>, vector<4x8x1xf32>
    tpu.vector_store %arg11[%c0_16, %c0_17, %c0_18], %28 {strides = array<i32>} : memref<4x8x1xf32, #tpu.memory_space<vmem>>, vector<4x8x1xf32>,
    %c0_19 = arith.constant 0 : index
    %c0_20 = arith.constant 0 : index
    %c0_21 = arith.constant 0 : index
    %c0_22 = arith.constant 0 : index
    %30 = vector.load %arg7[%c0_19, %c0_20, %c0_21, %c0_22] : memref<1x4x128x32xf32, #tpu.memory_space<vmem>>, vector<1x4x128x32xf32>
    %31 = vector.shape_cast %30 : vector<1x4x128x32xf32> to vector<4x128x32xf32>
    %cst_23 = arith.constant dense<0.000000e+00> : vector<4x8x32xf32>
    %32 = tpu.matmul %23, %31, %cst_23 {dimension_numbers = #tpu.dot_dimension_numbers<[2], [1], [1], [2], [0, 0, 0, 1, 1, 2], [0], [0]>} : vector<4x8x128xf32>, vector<4x128x32xf32>, vector<4x8x32xf32> -> vector<4x8x32xf32>
    %c0_24 = arith.constant 0 : index
    %c0_25 = arith.constant 0 : index
    %c0_26 = arith.constant 0 : index
    %33 = vector.load %arg12[%c0_24, %c0_25, %c0_26] : memref<4x8x32xf32, #tpu.memory_space<vmem>>, vector<4x8x32xf32>
    %34 = vector.broadcast %20 : vector<4x8x1xf32> to vector<4x8x32xf32>
    %35 = arith.mulf %34, %33 : vector<4x8x32xf32>
    %36 = arith.addf %35, %32 : vector<4x8x32xf32>
    %c0_27 = arith.constant 0 : index
    %c0_28 = arith.constant 0 : index
    %c0_29 = arith.constant 0 : index
    %37 = vector.load %arg12[%c0_27, %c0_28, %c0_29] : memref<4x8x32xf32, #tpu.memory_space<vmem>>, vector<4x8x32xf32>
    tpu.vector_store %arg12[%c0_27, %c0_28, %c0_29], %36 {strides = array<i32>} : memref<4x8x32xf32, #tpu.memory_space<vmem>>, vector<4x8x32xf32>,
    %c0_30 = arith.constant 0 : index
    %c0_31 = arith.constant 0 : index
    %c0_32 = arith.constant 0 : index
    %38 = vector.load %arg10[%c0_30, %c0_31, %c0_32] : memref<4x8x1xf32, #tpu.memory_space<vmem>>, vector<4x8x1xf32>
    tpu.vector_store %arg10[%c0_30, %c0_31, %c0_32], %18 {strides = array<i32>} : memref<4x8x1xf32, #tpu.memory_space<vmem>>, vector<4x8x1xf32>,
    %c0_i32_33 = arith.constant 0 : i32
    %39 = arith.cmpi eq, %arg3, %c0_i32_33 : i32
    %40 = arith.extui %39 : i1 to i32
    %c0_i32_34 = arith.constant 0 : i32
    %41 = arith.cmpi ne, %40, %c0_i32_34 : i32
    scf.if %41 {
      %c0_35 = arith.constant 0 : index
      %c0_36 = arith.constant 0 : index
      %c0_37 = arith.constant 0 : index
      %42 = vector.load %arg12[%c0_35, %c0_36, %c0_37] : memref<4x8x32xf32, #tpu.memory_space<vmem>>, vector<4x8x32xf32>
      %c0_38 = arith.constant 0 : index
      %c0_39 = arith.constant 0 : index
      %c0_40 = arith.constant 0 : index
      %43 = vector.load %arg11[%c0_38, %c0_39, %c0_40] : memref<4x8x1xf32, #tpu.memory_space<vmem>>, vector<4x8x1xf32>
      %44 = vector.broadcast %43 : vector<4x8x1xf32> to vector<4x8x32xf32>
      %45 = arith.divf %42, %44 : vector<4x8x32xf32>
      %c0_41 = arith.constant 0 : index
      %c0_42 = arith.constant 0 : index
      %c0_43 = arith.constant 0 : index
      %c0_44 = arith.constant 0 : index
      %46 = vector.load %arg8[%c0_41, %c0_42, %c0_43, %c0_44] : memref<1x4x8x32xf32, #tpu.memory_space<vmem>>, vector<1x4x8x32xf32>
      %47 = vector.shape_cast %46 : vector<1x4x8x32xf32> to vector<4x8x32xf32>
      %48 = vector.shape_cast %45 : vector<4x8x32xf32> to vector<1x4x8x32xf32>
      tpu.vector_store %arg8[%c0_41, %c0_42, %c0_43, %c0_44], %48 {strides = array<i32>} : memref<1x4x8x32xf32, #tpu.memory_space<vmem>>, vector<1x4x8x32xf32>,
    } else {
    }
    return
  }
  func.func @transform_0(%arg0: i32, %arg1: i32, %arg2: i32, %arg3: i32) -> (i32, i32, i32) {
    %c0_i32 = arith.constant 0 : i32
    %c0_i32_0 = arith.constant 0 : i32
    %c0_i32_1 = arith.constant 0 : i32
    return %arg1, %c0_i32, %c0_i32_0 : i32, i32, i32
  }
  func.func @transform_1(%arg0: i32, %arg1: i32, %arg2: i32, %arg3: i32) -> (i32, i32, i32, i32) {
    %c0_i32 = arith.constant 0 : i32
    %c0_i32_0 = arith.constant 0 : i32
    return %arg0, %arg1, %arg2, %c0_i32 : i32, i32, i32, i32
  }
  func.func @transform_2(%arg0: i32, %arg1: i32, %arg2: i32, %arg3: i32) -> (i32, i32, i32, i32) {
    %c0_i32 = arith.constant 0 : i32
    %c0_i32_0 = arith.constant 0 : i32
    return %arg0, %arg1, %arg3, %c0_i32 : i32, i32, i32, i32
  }
  func.func @transform_3(%arg0: i32, %arg1: i32, %arg2: i32, %arg3: i32) -> (i32, i32, i32, i32) {
    %c0_i32 = arith.constant 0 : i32
    %c0_i32_0 = arith.constant 0 : i32
    return %arg0, %arg1, %arg3, %c0_i32 : i32, i32, i32, i32
  }
  func.func @transform_4(%arg0: i32, %arg1: i32, %arg2: i32, %arg3: i32) -> (i32, i32, i32, i32) {
    %c0_i32 = arith.constant 0 : i32
    %c0_i32_0 = arith.constant 0 : i32
    return %arg0, %arg1, %arg2, %c0_i32 : i32, i32, i32, i32
  }
}

</mosaic_0001>

<bundles_post_ra>
// kernel: tpu_custom_call.1
= control target key start
LH: loop header
LB: loop body
LE: loop exit
PB: predicated region body
PF: predicated region fallthrough
CT: control target
= control target key end

     0   :  { %9 = vsyncpa [#allocation7], 0  ;;  %s3138_s0 = inlined_call_operand.vmem [shape: f32[8,1,1], index: 0, kind: input, shape index: {}]   ;;  %s3139_s1 = inlined_call_operand.vmem [shape: f32[1,8,8,32], index: 1, kind: input, shape index: {}]   ;;  %s3140_s2 = inlined_call_operand.vmem [shape: f32[1,8,128,32], index: 2, kind: input, shape index: {}]   ;;  %s3141_s3 = inlined_call_operand.vmem [shape: f32[1,8,128,32], index: 3, kind: input, shape index: {}]   ;;  %s3142_s4 = inlined_call_operand.hbm [shape: f32[1,8,8,32], index: 4, kind: output, shape index: {}]  }
   0x1   :  { %11 = vsyncpa [#allocation7 + $0x1], 0  ;;  %s2619_s15 = smov 0   ;;  %s2621_s16 = smov 0  }
   0x2   :  { %s2623_s17 = smov 0   ;;  %s2625_s18 = smov 0  }
   0x3   :  { %s2627_s19 = smov 0   ;;  %s2629_s20 = smov 0  }
   0x4 LB: > { %s1683_s21 = sadd.s32 4294967295, %s2584_s20   ;;  %s1684_s22 = sadd.s32 4294967294, %s2584_s20   ;;  %s2584_s20 = sphi %s2629_s20, %s17_s20   ;;  %s2580_s19 = sphi %s2627_s19, %s3151_s19   ;;  %s2576_s18 = sphi %s2625_s18, %s3150_s18   ;;  %s2572_s17 = sphi %s2623_s17, %s3149_s17   ;;  %s2568_s16 = sphi %s2621_s16, %s3148_s16   ;;  %s2564_s15 = sphi %s2619_s15, %s3147_s15  }
   0x5   : > { %s39_s23 = sadd.s32 1, %s2580_s19  ;;  %s170_s24 = sadd.s32 1, %s2572_s17 }
   0x6   : > { %p41_p0 = scmp.ge.s32.totalorder %s39_s23, 2  ;;  %p180_p1 = scmp.ne.s32.totalorder %s2572_s17, %s2568_s16 }
   0x7   : > { %p181_p2 = scmp.eq.s32.totalorder %s1683_s21, 1  ;;  %p186_p3 = scmp.ne.s32.totalorder %s2568_s16, %s2564_s15 }
   0x8   : > { %s3153_s23 = smov (%p41_p0, %s39_s23), 0  ;;  %p187_p5 = scmp.eq.s32.totalorder %s1684_s22, 1 }
   0x9   : > { %p2659_p4 = por %p181_p2, %p180_p1  ;;  %s164_s26 = ssub.s32 %s2580_s19, %s3153_s23 }
   0xa   : > { %p1687_p6 = scmp.ge.s32.totalorder %s2584_s20, 1  ;;  %p168_p7 = scmp.eq.s32.totalorder %s164_s26, 0 }
   0xb   : > { %p2666_p8 = por %p187_p5, %p186_p3  ;;  %p267_p9 = scmp.lt.s32.totalorder %s2584_s20, 3 }
   0xc   : > { %s2672_s28 = scalar_select %p168_p7, %s2572_s17, %s170_s24  }
   0xd   : > { %p268_p10 = pnand %p1687_p6, %p267_p9 }
   0xe   : > { %s1689_s29 = sshll.u32 (!%p268_p10), %s2576_s18, 2  ;;  %v2586_v0 = vmov (!%p268_p10), 0   ;;  %v2587_v1 = vmov (!%p268_p10), 0.0|0.0   ;;  %vm435_vm0 = vcmask (!%p268_p10), 261120   ;;  %vm2588_vm2 = vmmov (!%p268_p10), 0   ;;  %s329_s26 = sand.u32 (!%p268_p10), 1, %s2568_s16  }
   0xf   : > { %271 = sbr.rel (%p268_p10) target bundleno = 1037 (0x40d), region = 36  ;;  %2480 = vset.pattern.permute.xlu0 (!%p268_p10), %v2586_v0  ;;  %p333_p11 = scmp.lt.s32.totalorder (!%p268_p10), %s1689_s29, 7  ;;  %2481 = vset.pattern.permute.xlu1 (!%p268_p10), %v2586_v0  ;;  %vm2693_vm1 = vmpackc.low (!%p268_p10), %vm435_vm0, %vm435_vm0  ;;  %v2589_v18 = vmov (!%p268_p10), 0.0   ;;  %vm440_vm3 = vcmask (!%p268_p10), 7168   ;;  %v1007_v4 = vlaneseq (!%p268_p10) }
  0x10   : > { %2194 = vmatprep.subr.bf16.mxu0 (!%p268_p10), %v2587_v1  ;;  %2226 = vmatprep.subr.bf16.mxu1 (!%p268_p10), %v2587_v1  ;;  %449 = vst.msk [vmem:[#allocation5] sm:$0xff] (!%p268_p10), %vm435_vm0, %v2589_v18  ;;  %450 = vst.msk [vmem:[#allocation5 + $0x8] sm:$0xff] (!%p268_p10), %vm435_vm0, %v2589_v18  ;;  %s1777_s5 = sshll.u32 (!%p268_p10), %s2576_s18, 9 }
  0x11   : > { %1946 = vmatprep.mubr.msk.f32.mxu0 (!%p268_p10), %vm2588_vm2, %v2589_v18  ;;  %451 = vst.msk [vmem:[#allocation5 + $0x10] sm:$0xff] (!%p268_p10), %vm435_vm0, %v2589_v18  ;;  %452 = vst.msk [vmem:[#allocation5 + $0x18] sm:$0xff] (!%p268_p10), %vm435_vm0, %v2589_v18  ;;  %1981 = vmatprep.mubr.msk.f32.mxu1 (!%p268_p10), %vm2588_vm2, %v2589_v18  ;;  %s3087_s9 = scalar_lea.hbm (!%p268_p10), %s3142_s4, %s1777_s5 }
  0x12   : > { %445 = vst.msk [vmem:[#allocation4] sm:$0xff] (!%p268_p10), %vm440_vm3, %v2589_v18  ;;  %446 = vst.msk [vmem:[#allocation4 + $0x8] sm:$0xff] (!%p268_p10), %vm440_vm3, %v2589_v18 }
  0x13   : > { %447 = vst.msk [vmem:[#allocation4 + $0x10] sm:$0xff] (!%p268_p10), %vm440_vm3, %v2589_v18  ;;  %448 = vst.msk [vmem:[#allocation4 + $0x18] sm:$0xff] (!%p268_p10), %vm440_vm3, %v2589_v18 }
  0x16   : > { %s3155_s29 = smov (!%p333_p11, %s1689_s29), 7 }
  0x17   : > { %s335_s6 = scalar_lea.vmem %s3138_s0, %s3155_s29  ;;  %s1775_s7 = sshll.u32 %s3155_s29, 7 }
  0x18   : > { %s2689_s10 = scalar_lea.vmem %s3140_s2, %s1775_s7  ;;  %v1698_v2 = vld [vmem:[%s335_s6] ss:$0 sm:$0xff]  ;;  %v1700_v3 = vld [vmem:[%s335_s6 + $0x2] ss:$0 sm:$0xff]  ;;  %v1699_v5 = vld [vmem:[%s335_s6 + $0x1] ss:$0 sm:$0xff]  ;;  %s2918_s24 = scalar_lea.vmem %s3141_s3, %s1775_s7 }
  0x19   : > { %416 = vperm.xlu0 %2480, %v1698_v2   ;;  %424 = vperm.xlu1 %2481, %v1700_v3   ;;  %v457_v6 = vld [vmem:[%s2689_s10] sm:$0xff]  ;;  %v458_v7 = vld [vmem:[%s2689_s10 + $0x8] sm:$0xff]  ;;  %v459_v13 = vld [vmem:[%s2689_s10 + $0x10] sm:$0xff]  ;;  %s1691_s11 = sshll.u32 %s3155_s29, 3  ;;  %s1688_s29 = sshll.u32 %s329_s26, 5 }
  0x1a   : > { %v1701_v8 = vld [vmem:[%s335_s6 + $0x3] ss:$0 sm:$0xff]  ;;  %v2195_v9 = vpack.c.bf16 %v458_v7, %v457_v6  ;;  %v474_v11 = vld [vmem:[%s2689_s10 + $0x88] sm:$0xff]  ;;  %v460_v14 = vld [vmem:[%s2689_s10 + $0x18] sm:$0xff]  ;;  %s348_s14 = scalar_lea.vmem %s3139_s1, %s1691_s11  ;;  %s331_s30 = scalar_lea.vmem [#allocation6], %s1688_s29 }
  0x1b   : > { %v473_v10 = vld [vmem:[%s2689_s10 + $0x80] sm:$0xff]  ;;  %v475_v15 = vld [vmem:[%s2689_s10 + $0x90] sm:$0xff]  ;;  %v476_v16 = vld [vmem:[%s2689_s10 + $0x98] sm:$0xff]  ;;  %v2199_v17 = vpack.c.bf16 %v460_v14, %v459_v13  ;;  %s1537_s6 = sshll.u32 %s331_s30, 4  ;;  %s2591_s11 = smov [#allocation6]   ;;  %s3089_s6 = int_to_ptr.vmem [resolvable:$true] %s1537_s6 }
  0x1c   : > { %v2227_v12 = vpack.c.bf16 %v474_v11, %v473_v10  ;;  %2197 = vmatpush3.bf16.xpose.msk.msra.mxu0 %vm2693_vm1, %v2195_v9  ;;  %v2231_v19 = vpack.c.bf16 %v476_v16, %v475_v15  ;;  %v461_v20 = vld [vmem:[%s2689_s10 + $0x20] sm:$0xff]  ;;  %v462_v21 = vld [vmem:[%s2689_s10 + $0x28] sm:$0xff]  ;;  %v463_v26 = vld [vmem:[%s2689_s10 + $0x30] sm:$0xff]  ;;  %s2506_s18 = scalar_lea.vmem %s3089_s6, 512  ;;  %s2510_s12 = sshll.u32 %s2591_s11, 4  ;;  %s2511_s12 = int_to_ptr.vmem [resolvable:$false] %s2510_s12 }
  0x1d   : > { %420 = vperm.xlu0 %2480, %v1699_v5   ;;  %428 = vperm.xlu1 %2481, %v1701_v8   ;;  %v477_v22 = vld [vmem:[%s2689_s10 + $0xa0] sm:$0xff]  ;;  %v478_v23 = vld [vmem:[%s2689_s10 + $0xa8] sm:$0xff]  ;;  %v2203_v24 = vpack.c.bf16 %v462_v21, %v461_v20  ;;  %v464_v27 = vld [vmem:[%s2689_s10 + $0x38] sm:$0xff]  ;;  %p2507_p12 = scmp.ne.s32.totalorder %s3089_s6, %s2506_s18  ;;  %s2512_s13 = scalar_lea.vmem %s2511_s12, 1024 }
  0x1e   : > { %2229 = vmatpush3.bf16.xpose.msk.msra.mxu1 %vm2693_vm1, %v2227_v12  ;;  %2198 = vmatprep.subr.bf16.mxu0 %v2587_v1  ;;  %v2235_v25 = vpack.c.bf16 %v478_v23, %v477_v22  ;;  %v479_v28 = vld [vmem:[%s2689_s10 + $0xb0] sm:$0xff]  ;;  %v480_v29 = vld [vmem:[%s2689_s10 + $0xb8] sm:$0xff]  ;;  %v2207_v30 = vpack.c.bf16 %v464_v27, %v463_v26  ;;  %v465_v32 = vld [vmem:[%s2689_s10 + $0x40] sm:$0xff]  ;;  %p2513_p1 = scmp.lt.s32.totalorder %s3089_s6, %s2511_s12  ;;  %p2514_p2 = scmp.lt.s32.totalorder %s2512_s13, %s2506_s18 }
  0x1f   : > { %2230 = vmatprep.subr.bf16.mxu1 %v2587_v1  ;;  %v2239_v31 = vpack.c.bf16 %v480_v29, %v479_v28  ;;  %v466_v33 = vld [vmem:[%s2689_s10 + $0x48] sm:$0xff]  ;;  %v481_v34 = vld [vmem:[%s2689_s10 + $0xc0] sm:$0xff]  ;;  %v467_v38 = vld [vmem:[%s2689_s10 + $0x50] sm:$0xff]  ;;  %p2508_p13 = pnand %p2507_p12, %p2659_p4 }
  0x20   : > { %v482_v35 = vld [vmem:[%s2689_s10 + $0xc8] sm:$0xff]  ;;  %v2211_v36 = vpack.c.bf16 %v466_v33, %v465_v32  ;;  %v468_v39 = vld [vmem:[%s2689_s10 + $0x58] sm:$0xff]  ;;  %v483_v40 = vld [vmem:[%s2689_s10 + $0xd0] sm:$0xff]  ;;  %p2515_p3 = por %p2514_p2, %p2513_p1 }
  0x21   : > { %v2243_v37 = vpack.c.bf16 %v482_v35, %v481_v34  ;;  %v484_v41 = vld [vmem:[%s2689_s10 + $0xd8] sm:$0xff]  ;;  %v2215_v42 = vpack.c.bf16 %v468_v39, %v467_v38  ;;  %v469_v44 = vld [vmem:[%s2689_s10 + $0x60] sm:$0xff]  ;;  %v470_v45 = vld [vmem:[%s2689_s10 + $0x68] sm:$0xff]  ;;  %p2509_p0 = pneg %p2508_p13 }
  0x22   : > { %v2247_v43 = vpack.c.bf16 %v484_v41, %v483_v40  ;;  %v485_v46 = vld [vmem:[%s2689_s10 + $0xe0] sm:$0xff]  ;;  %v486_v47 = vld [vmem:[%s2689_s10 + $0xe8] sm:$0xff]  ;;  %v2219_v48 = vpack.c.bf16 %v470_v45, %v469_v44  ;;  %v471_v50 = vld [vmem:[%s2689_s10 + $0x70] sm:$0xff] }
  0x23   : > { %v2251_v49 = vpack.c.bf16 %v486_v47, %v485_v46  ;;  %v472_v51 = vld [vmem:[%s2689_s10 + $0x78] sm:$0xff]  ;;  %v487_v52 = vld [vmem:[%s2689_s10 + $0xf0] sm:$0xff]  ;;  %v387_v56 = vld [vmem:[%s348_s14] sm:$0xff]  ;;  %p2516_p5 = pnand %p2515_p3, %p2509_p0 }
  0x24   : > { %2201 = vmatpush3.bf16.xpose.msk.msra.mxu0 %vm2693_vm1, %v2199_v17  ;;  %v488_v53 = vld [vmem:[%s2689_s10 + $0xf8] sm:$0xff]  ;;  %v2223_v54 = vpack.c.bf16 %v472_v51, %v471_v50  ;;  %v389_v57 = vld [vmem:[%s348_s14 + $0x10] sm:$0xff]  ;;  %v388_v62 = vld [vmem:[%s348_s14 + $0x8] sm:$0xff] }
  0x25   : > { %2202 = vmatprep.subr.bf16.mxu0 %v2587_v1  ;;  %v2255_v55 = vpack.c.bf16 %v488_v53, %v487_v52  ;;  %v390_v63 = vld [vmem:[%s348_s14 + $0x18] sm:$0xff]  ;;  %v489_v5 = vld [vmem:[%s2689_s10 + $0x100] sm:$0xff]  ;;  %v490_v6 = vld [vmem:[%s2689_s10 + $0x108] sm:$0xff] }
  0x26   : > { %2233 = vmatpush3.bf16.xpose.msk.msra.mxu1 %vm2693_vm1, %v2231_v19  ;;  %v2259_v8 = vpack.c.bf16 %v490_v6, %v489_v5  ;;  %v505_v9 = vld [vmem:[%s2689_s10 + $0x180] sm:$0xff]  ;;  %v506_v10 = vld [vmem:[%s2689_s10 + $0x188] sm:$0xff]  ;;  %v491_v13 = vld [vmem:[%s2689_s10 + $0x110] sm:$0xff] }
  0x27   : > { %2234 = vmatprep.subr.bf16.mxu1 %v2587_v1  ;;  %v2291_v12 = vpack.c.bf16 %v506_v10, %v505_v9  ;;  %v492_v14 = vld [vmem:[%s2689_s10 + $0x118] sm:$0xff]  ;;  %v507_v17 = vld [vmem:[%s2689_s10 + $0x190] sm:$0xff]  ;;  %v493_v21 = vld [vmem:[%s2689_s10 + $0x120] sm:$0xff] }
  0x28   : > { %v2263_v16 = vpack.c.bf16 %v492_v14, %v491_v13  ;;  %v508_v19 = vld [vmem:[%s2689_s10 + $0x198] sm:$0xff]  ;;  %v494_v22 = vld [vmem:[%s2689_s10 + $0x128] sm:$0xff]  ;;  %v495_v27 = vld [vmem:[%s2689_s10 + $0x130] sm:$0xff] }
  0x29   : > { %v2295_v20 = vpack.c.bf16 %v508_v19, %v507_v17  ;;  %v2267_v23 = vpack.c.bf16 %v494_v22, %v493_v21  ;;  %v496_v28 = vld [vmem:[%s2689_s10 + $0x138] sm:$0xff]  ;;  %v497_v33 = vld [vmem:[%s2689_s10 + $0x140] sm:$0xff]  ;;  %v498_v34 = vld [vmem:[%s2689_s10 + $0x148] sm:$0xff] }
  0x2a   : > { %v2271_v29 = vpack.c.bf16 %v496_v28, %v495_v27  ;;  %v2275_v35 = vpack.c.bf16 %v498_v34, %v497_v33  ;;  %v499_v39 = vld [vmem:[%s2689_s10 + $0x150] sm:$0xff]  ;;  %v500_v40 = vld [vmem:[%s2689_s10 + $0x158] sm:$0xff]  ;;  %v501_v45 = vld [vmem:[%s2689_s10 + $0x160] sm:$0xff] }
  0x2b   : > { %v2279_v41 = vpack.c.bf16 %v500_v40, %v499_v39  ;;  %v502_v46 = vld [vmem:[%s2689_s10 + $0x168] sm:$0xff]  ;;  %v503_v51 = vld [vmem:[%s2689_s10 + $0x170] sm:$0xff]  ;;  %v504_v52 = vld [vmem:[%s2689_s10 + $0x178] sm:$0xff] }
  0x2c   : > { %2205 = vmatpush3.bf16.xpose.msk.msra.mxu0 %vm2693_vm1, %v2203_v24  ;;  %v509_v24 = vld [vmem:[%s2689_s10 + $0x1a0] sm:$0xff]  ;;  %v2283_v47 = vpack.c.bf16 %v502_v46, %v501_v45  ;;  %v2287_v53 = vpack.c.bf16 %v504_v52, %v503_v51  ;;  %v1095_v13 = vld [vmem:[%s2918_s24 + $0x10] sm:$0xff]  ;;  %v1110_v17 = vld [vmem:[%s2918_s24 + $0x88] sm:$0xff] }
  0x2d   : > { %2206 = vmatprep.subr.bf16.mxu0 %v2587_v1  ;;  %v1112_v22 = vld [vmem:[%s2918_s24 + $0x98] sm:$0xff]  ;;  %v1114_v27 = vld [vmem:[%s2918_s24 + $0xa8] sm:$0xff]  ;;  %v1117_v46 = vld [vmem:[%s2918_s24 + $0xc0] sm:$0xff] }
  0x2e   : > { %2237 = vmatpush3.bf16.xpose.msk.msra.mxu1 %vm2693_vm1, %v2235_v25  ;;  %v510_v25 = vld [vmem:[%s2689_s10 + $0x1a8] sm:$0xff]  ;;  %v1116_v33 = vld [vmem:[%s2918_s24 + $0xb8] sm:$0xff] }
  0x2f   : > { %2238 = vmatprep.subr.bf16.mxu1 %v2587_v1  ;;  %v2299_v26 = vpack.c.bf16 %v510_v25, %v509_v24  ;;  %v1098_v24 = vld [vmem:[%s2918_s24 + $0x28] sm:$0xff]  ;;  %v1104_v45 = vld [vmem:[%s2918_s24 + $0x58] sm:$0xff] }
  0x34   : > { %2209 = vmatpush3.bf16.xpose.msk.msra.mxu0 %vm2693_vm1, %v2207_v30  ;;  %v511_v30 = vld [vmem:[%s2689_s10 + $0x1b0] sm:$0xff] }
  0x35   : > { %2210 = vmatprep.subr.bf16.mxu0 %v2587_v1 }
  0x36   : > { %2241 = vmatpush3.bf16.xpose.msk.msra.mxu1 %vm2693_vm1, %v2239_v31  ;;  %v512_v31 = vld [vmem:[%s2689_s10 + $0x1b8] sm:$0xff] }
  0x37   : > { %2242 = vmatprep.subr.bf16.mxu1 %v2587_v1  ;;  %v2303_v32 = vpack.c.bf16 %v512_v31, %v511_v30  ;;  %v1100_v30 = vld [vmem:[%s2918_s24 + $0x38] sm:$0xff] }
  0x3c   : > { %2213 = vmatpush3.bf16.xpose.msk.msra.mxu0 %vm2693_vm1, %v2211_v36  ;;  %v513_v36 = vld [vmem:[%s2689_s10 + $0x1c0] sm:$0xff] }
  0x3d   : > { %2214 = vmatprep.subr.bf16.mxu0 %v2587_v1 }
  0x3e   : > { %2245 = vmatpush3.bf16.xpose.msk.msra.mxu1 %vm2693_vm1, %v2243_v37  ;;  %v514_v37 = vld [vmem:[%s2689_s10 + $0x1c8] sm:$0xff] }
  0x3f   : > { %2246 = vmatprep.subr.bf16.mxu1 %v2587_v1  ;;  %v2307_v38 = vpack.c.bf16 %v514_v37, %v513_v36  ;;  %v1102_v36 = vld [vmem:[%s2918_s24 + $0x48] sm:$0xff] }
  0x44   : > { %2217 = vmatpush3.bf16.xpose.msk.msra.mxu0 %vm2693_vm1, %v2215_v42  ;;  %v515_v42 = vld [vmem:[%s2689_s10 + $0x1d0] sm:$0xff] }
  0x45   : > { %2218 = vmatprep.subr.bf16.mxu0 %v2587_v1 }
  0x46   : > { %2249 = vmatpush3.bf16.xpose.msk.msra.mxu1 %vm2693_vm1, %v2247_v43  ;;  %v516_v43 = vld [vmem:[%s2689_s10 + $0x1d8] sm:$0xff] }
  0x47   : > { %2250 = vmatprep.subr.bf16.mxu1 %v2587_v1  ;;  %v2311_v44 = vpack.c.bf16 %v516_v43, %v515_v42 }
  0x4c   : > { %2221 = vmatpush3.bf16.xpose.msk.msra.mxu0 %vm2693_vm1, %v2219_v48  ;;  %v517_v48 = vld [vmem:[%s2689_s10 + $0x1e0] sm:$0xff] }
  0x4d   : > { %2222 = vmatprep.subr.bf16.mxu0 %v2587_v1 }
  0x4e   : > { %2253 = vmatpush3.bf16.xpose.msk.msra.mxu1 %vm2693_vm1, %v2251_v49  ;;  %v518_v49 = vld [vmem:[%s2689_s10 + $0x1e8] sm:$0xff] }
  0x4f   : > { %2254 = vmatprep.subr.bf16.mxu1 %v2587_v1  ;;  %v2315_v50 = vpack.c.bf16 %v518_v49, %v517_v48  ;;  %v1118_v49 = vld [vmem:[%s2918_s24 + $0xc8] sm:$0xff] }
  0x50   : > { %v2359_v51 = vpack.c.bf16 %v1118_v49, %v1117_v46  ;;  %v1147_v49 = vld [vmem:[%s2918_s24 + $0x1b0] sm:$0xff] }
  0x54   : > { %2225 = vmatpush3.bf16.xpose.msk.msra.mxu0 %vm2693_vm1, %v2223_v54  ;;  %v519_v54 = vld [vmem:[%s2689_s10 + $0x1f0] sm:$0xff] }
  0x55   : > { %2258 = vmatprep.subr.bf16.mxu0 %v2587_v1 }
  0x56   : > { %2257 = vmatpush3.bf16.xpose.msk.msra.mxu1 %vm2693_vm1, %v2255_v55  ;;  %v520_v55 = vld [vmem:[%s2689_s10 + $0x1f8] sm:$0xff]  ;;  %s3092_s10 = scalar_lea.sflag [#allocation7], %s329_s26 }
  0x57   : > { %2290 = vmatprep.subr.bf16.mxu1 %v2587_v1 }
  0x98   : > { %v417_v58 = vpop.permute.xlu0 %416  ;;  %v425_v59 = vpop.permute.xlu1 %424 }
  0x99   : > { %v431_v60 = vmul.f32 %v417_v58, %v387_v56  ;;  %v433_v61 = vmul.f32 %v425_v59, %v389_v57  ;;  %v2319_v56 = vpack.c.bf16 %v520_v55, %v519_v54  ;;  %v2590_v59 = vmov -1e+30   ;;  %v1106_v54 = vld [vmem:[%s2918_s24 + $0x68] sm:$0xff]  ;;  %v1119_v55 = vld [vmem:[%s2918_s24 + $0xd0] sm:$0xff] }
  0x9a   : > { %441 = vst.msk [vmem:[#allocation3] sm:$0xff] %vm440_vm3, %v2590_v59  ;;  %442 = vst.msk [vmem:[#allocation3 + $0x8] sm:$0xff] %vm440_vm3, %v2590_v59 }
  0x9b   : > { %436 = vst.msk [vmem:[#allocation2] sm:$0xff] %vm435_vm0, %v431_v60  ;;  %438 = vst.msk [vmem:[#allocation2 + $0x10] sm:$0xff] %vm435_vm0, %v433_v61  ;;  %v1008_v60 = vand.u32 127, %v1007_v4  ;;  %v1108_v4 = vld [vmem:[%s2918_s24 + $0x78] sm:$0xff] }
  0x9c   : > { %v421_v0 = vpop.permute.xlu0 %420  ;;  %v429_v2 = vpop.permute.xlu1 %428  ;;  %443 = vst.msk [vmem:[#allocation3 + $0x10] sm:$0xff] %vm440_vm3, %v2590_v59  ;;  %444 = vst.msk [vmem:[#allocation3 + $0x18] sm:$0xff] %vm440_vm3, %v2590_v59  ;;  %v1107_v59 = vld [vmem:[%s2918_s24 + $0x70] sm:$0xff] }
  0x9d   : > { %v432_v3 = vmul.f32 %v421_v0, %v388_v62  ;;  %v434_v7 = vmul.f32 %v429_v2, %v390_v63  ;;  %vm1011_vm4 = vcmp.lt.s32.totalorder %v1008_v60, 7  ;;  %v1121_v60 = vld [vmem:[%s2918_s24 + $0xe0] sm:$0xff] }
  0x9f   : > { %437 = vst.msk [vmem:[#allocation2 + $0x8] sm:$0xff] %vm435_vm0, %v432_v3  ;;  %439 = vst.msk [vmem:[#allocation2 + $0x18] sm:$0xff] %vm435_vm0, %v434_v7 }
  0xa1   : > { %v2947_v39 = vld [vmem:[#allocation3] sm:$0xff]  ;;  %v2952_v42 = vld [vmem:[#allocation3 + $0x8] sm:$0xff] }
  0xa2   : > { %v453_v11 = vld [vmem:[#allocation2] sm:$0xff]  ;;  %v455_v57 = vld [vmem:[#allocation2 + $0x10] sm:$0xff] }
  0xa3   : > { %1947 = vmatmul.mubr.msk.f32.vlgmr.msra.gmra.mrb[0].mxu0 %vm435_vm0, %v453_v11  ;;  %v1093_v11 = vld [vmem:[%s2918_s24] sm:$0xff] }
  0xa4   : > { %2261 = vmatpush3.bf16.xpose.msk.msra.mxu0 %vm2693_vm1, %v2259_v8  ;;  %2016 = vmatprep.mubr.msk.f32.mxu0 %vm2588_vm2, %v2589_v18 }
  0xa5   : > { %2262 = vmatprep.subr.bf16.mxu0 %v2587_v1 }
  0xa6   : > { %v454_v15 = vld [vmem:[#allocation2 + $0x8] sm:$0xff]  ;;  %v456_v58 = vld [vmem:[#allocation2 + $0x18] sm:$0xff] }
  0xa7   : > { %1982 = vmatmul.mubr.msk.f32.vlgmr.msra.gmra.mrb[0].mxu1 %vm435_vm0, %v454_v15  ;;  %v1096_v15 = vld [vmem:[%s2918_s24 + $0x18] sm:$0xff] }
  0xa8   : > { %2293 = vmatpush3.bf16.xpose.msk.msra.mxu1 %vm2693_vm1, %v2291_v12  ;;  %2051 = vmatprep.mubr.msk.f32.mxu1 %vm2588_vm2, %v2589_v18  ;;  %v1094_v12 = vld [vmem:[%s2918_s24 + $0x8] sm:$0xff]  ;;  %v2326_v21 = vpack.c.bf16 %v1096_v15, %v1095_v13 }
  0xa9   : > { %2294 = vmatprep.subr.bf16.mxu1 %v2587_v1  ;;  %v2323_v14 = vpack.c.bf16 %v1094_v12, %v1093_v11  ;;  %v2993_v12 = vld [vmem:[#allocation3 + $0x18] sm:$0xff] }
  0xac   : > { %2265 = vmatpush3.bf16.xpose.msk.msra.mxu0 %vm2693_vm1, %v2263_v16  ;;  %v1109_v16 = vld [vmem:[%s2918_s24 + $0x80] sm:$0xff] }
  0xad   : > { %2266 = vmatprep.subr.bf16.mxu0 %v2587_v1  ;;  %v2347_v19 = vpack.c.bf16 %v1110_v17, %v1109_v16 }
  0xb0   : > { %2297 = vmatpush3.bf16.xpose.msk.msra.mxu1 %vm2693_vm1, %v2295_v20  ;;  %v1111_v20 = vld [vmem:[%s2918_s24 + $0x90] sm:$0xff] }
  0xb1   : > { %2298 = vmatprep.subr.bf16.mxu1 %v2587_v1  ;;  %v2350_v25 = vpack.c.bf16 %v1112_v22, %v1111_v20  ;;  %v1125_v22 = vld [vmem:[%s2918_s24 + $0x100] sm:$0xff] }
  0xb4   : > { %2269 = vmatpush3.bf16.xpose.msk.msra.mxu0 %vm2693_vm1, %v2267_v23  ;;  %v1097_v23 = vld [vmem:[%s2918_s24 + $0x20] sm:$0xff] }
  0xb5   : > { %2270 = vmatprep.subr.bf16.mxu0 %v2587_v1  ;;  %v2329_v28 = vpack.c.bf16 %v1098_v24, %v1097_v23  ;;  %v1126_v23 = vld [vmem:[%s2918_s24 + $0x108] sm:$0xff] }
  0xb6   : > { %v2371_v24 = vpack.c.bf16 %v1126_v23, %v1125_v22  ;;  %v1068_v23 = vld [vmem:[#allocation4] sm:$0xff] }
  0xb8   : > { %2301 = vmatpush3.bf16.xpose.msk.msra.mxu1 %vm2693_vm1, %v2299_v26  ;;  %v1113_v26 = vld [vmem:[%s2918_s24 + $0xa0] sm:$0xff] }
  0xb9   : > { %2302 = vmatprep.subr.bf16.mxu1 %v2587_v1  ;;  %v2353_v31 = vpack.c.bf16 %v1114_v27, %v1113_v26  ;;  %v1128_v26 = vld [vmem:[%s2918_s24 + $0x118] sm:$0xff]  ;;  %v1141_v27 = vld [vmem:[%s2918_s24 + $0x180] sm:$0xff] }
  0xbc   : > { %2273 = vmatpush3.bf16.xpose.msk.msra.mxu0 %vm2693_vm1, %v2271_v29  ;;  %v1099_v29 = vld [vmem:[%s2918_s24 + $0x30] sm:$0xff] }
  0xbd   : > { %2274 = vmatprep.subr.bf16.mxu0 %v2587_v1  ;;  %v2332_v34 = vpack.c.bf16 %v1100_v30, %v1099_v29 }
  0xc0   : > { %2305 = vmatpush3.bf16.xpose.msk.msra.mxu1 %vm2693_vm1, %v2303_v32  ;;  %v1115_v32 = vld [vmem:[%s2918_s24 + $0xb0] sm:$0xff] }
  0xc1   : > { %2306 = vmatprep.subr.bf16.mxu1 %v2587_v1  ;;  %v2356_v37 = vpack.c.bf16 %v1116_v33, %v1115_v32  ;;  %v1143_v32 = vld [vmem:[%s2918_s24 + $0x190] sm:$0xff]  ;;  %v1144_v33 = vld [vmem:[%s2918_s24 + $0x198] sm:$0xff] }
  0xc4   : > { %2277 = vmatpush3.bf16.xpose.msk.msra.mxu0 %vm2693_vm1, %v2275_v35  ;;  %v1101_v35 = vld [vmem:[%s2918_s24 + $0x40] sm:$0xff] }
  0xc5   : > { %2278 = vmatprep.subr.bf16.mxu0 %v2587_v1 }
  0xc8   : > { %2309 = vmatpush3.bf16.xpose.msk.msra.mxu1 %vm2693_vm1, %v2307_v38  ;;  %v2335_v38 = vpack.c.bf16 %v1102_v36, %v1101_v35  ;;  %v2398_v36 = vpack.c.bf16 %v1144_v33, %v1143_v32 }
  0xc9   : > { %2310 = vmatprep.subr.bf16.mxu1 %v2587_v1 }
  0xcc   : > { %2281 = vmatpush3.bf16.xpose.msk.msra.mxu0 %vm2693_vm1, %v2279_v41 }
  0xcd   : > { %2282 = vmatprep.subr.bf16.mxu0 %v2587_v1 }
  0xd0   : > { %2313 = vmatpush3.bf16.xpose.msk.msra.mxu1 %vm2693_vm1, %v2311_v44  ;;  %v1103_v44 = vld [vmem:[%s2918_s24 + $0x50] sm:$0xff] }
  0xd1   : > { %2314 = vmatprep.subr.bf16.mxu1 %v2587_v1  ;;  %v2338_v48 = vpack.c.bf16 %v1104_v45, %v1103_v44  ;;  %v1146_v44 = vld [vmem:[%s2918_s24 + $0x1a8] sm:$0xff] }
  0xd4   : > { %2285 = vmatpush3.bf16.xpose.msk.msra.mxu0 %vm2693_vm1, %v2283_v47 }
  0xd5   : > { %2286 = vmatprep.subr.bf16.mxu0 %v2587_v1 }
  0xd8   : > { %2317 = vmatpush3.bf16.xpose.msk.msra.mxu1 %vm2693_vm1, %v2315_v50 }
  0xd9   : > { %2318 = vmatprep.subr.bf16.mxu1 %v2587_v1 }
  0xdc   : > { %2289 = vmatpush3.bf16.xpose.msk.msra.mxu0 %vm2693_vm1, %v2287_v53  ;;  %v1105_v53 = vld [vmem:[%s2918_s24 + $0x60] sm:$0xff] }
  0xdd   : > { %2322 = vmatprep.subr.bf16.mxu0 %v2587_v1 }
  0xe0   : > { %2321 = vmatpush3.bf16.xpose.msk.msra.mxu1 %vm2693_vm1, %v2319_v56  ;;  %v2341_v56 = vpack.c.bf16 %v1106_v54, %v1105_v53  ;;  %v1150_v54 = vld [vmem:[%s2918_s24 + $0x1c8] sm:$0xff] }
  0xe1   : > { %2346 = vmatprep.subr.bf16.mxu1 %v2587_v1 }
  0xe3   : > { %2017 = vmatmul.mubr.msk.f32.vlgmr.msra.gmra.mrb[2].mxu0 %vm435_vm0, %v455_v57  ;;  %v1120_v57 = vld [vmem:[%s2918_s24 + $0xd8] sm:$0xff] }
  0xe4   : > { %2086 = vmatprep.mubr.msk.f32.mxu0 %vm2588_vm2, %v2589_v18  ;;  %2324 = vmatpush3.bf16.msra.mxu0 %v2323_v14 }
  0xe5   : > { %2325 = vmatprep.subr.bf16.mxu0 %v2587_v1 }
  0xe7   : > { %2052 = vmatmul.mubr.msk.f32.vlgmr.msra.gmra.mrb[2].mxu1 %vm435_vm0, %v456_v58  ;;  %v2362_v58 = vpack.c.bf16 %v1120_v57, %v1119_v55  ;;  %v1137_v57 = vld [vmem:[%s2918_s24 + $0x160] sm:$0xff] }
  0xe8   : > { %2121 = vmatprep.mubr.msk.f32.mxu1 %vm2588_vm2, %v2589_v18  ;;  %2348 = vmatpush3.bf16.msra.mxu1 %v2347_v19 }
  0xe9   : > { %2349 = vmatprep.subr.bf16.mxu1 %v2587_v1  ;;  %2327 = vmatpush3.bf16.msra.mxu0 %v2326_v21 }
  0xea   : > { %2328 = vmatprep.subr.bf16.mxu0 %v2587_v1 }
  0xec   : > { %2351 = vmatpush3.bf16.msra.mxu1 %v2350_v25  ;;  %v1127_v25 = vld [vmem:[%s2918_s24 + $0x110] sm:$0xff] }
  0xed   : > { %2352 = vmatprep.subr.bf16.mxu1 %v2587_v1  ;;  %2330 = vmatpush3.bf16.msra.mxu0 %v2329_v28  ;;  %v1142_v28 = vld [vmem:[%s2918_s24 + $0x188] sm:$0xff] }
  0xee   : > { %2331 = vmatprep.subr.bf16.mxu0 %v2587_v1  ;;  %v2395_v30 = vpack.c.bf16 %v1142_v28, %v1141_v27 }
  0xf0   : > { %2354 = vmatpush3.bf16.msra.mxu1 %v2353_v31  ;;  %v1129_v31 = vld [vmem:[%s2918_s24 + $0x120] sm:$0xff] }
  0xf1   : > { %2355 = vmatprep.subr.bf16.mxu1 %v2587_v1  ;;  %2333 = vmatpush3.bf16.msra.mxu0 %v2332_v34 }
  0xf2   : > { %2334 = vmatprep.subr.bf16.mxu0 %v2587_v1 }
  0xf4   : > { %2357 = vmatpush3.bf16.msra.mxu1 %v2356_v37  ;;  %v1131_v37 = vld [vmem:[%s2918_s24 + $0x130] sm:$0xff] }
  0xf5   : > { %2358 = vmatprep.subr.bf16.mxu1 %v2587_v1  ;;  %2336 = vmatpush3.bf16.msra.mxu0 %v2335_v38  ;;  %v1132_v38 = vld [vmem:[%s2918_s24 + $0x138] sm:$0xff] }
  0xf6   : > { %2337 = vmatprep.subr.bf16.mxu0 %v2587_v1  ;;  %v2380_v45 = vpack.c.bf16 %v1132_v38, %v1131_v37 }
  0xf8   : > { %2360 = vmatpush3.bf16.msra.mxu1 %v2359_v51 }
  0xf9   : > { %2339 = vmatpush3.bf16.msra.mxu0 %v2338_v48  ;;  %2361 = vmatprep.subr.bf16.mxu1 %v2587_v1  ;;  %v1134_v48 = vld [vmem:[%s2918_s24 + $0x148] sm:$0xff] }
  0xfa   : > { %2340 = vmatprep.subr.bf16.mxu0 %v2587_v1 }
  0xfc   : > { %2363 = vmatpush3.bf16.msra.mxu1 %v2362_v58  ;;  %v1138_v58 = vld [vmem:[%s2918_s24 + $0x168] sm:$0xff] }
  0xfd   : > { %2342 = vmatpush3.bf16.msra.mxu0 %v2341_v56  ;;  %2364 = vmatprep.subr.bf16.mxu1 %v2587_v1 }
  0xfe   : > { %2343 = vmatprep.subr.bf16.mxu0 %v2587_v1 }
 0x176   : > { %v639_v61 = vpop.f32.mrb[0].mxu0 }
 0x177   : > { %v1948_v62 = vpop.f32.mrb[1].mxu0  ;;  %v2901_v63 = vsel %vm1011_vm4, %v639_v61, -1e+30  ;;  %v2344_v61 = vpack.c.bf16 %v1108_v4, %v1107_v59  ;;  %v1151_v59 = vld [vmem:[%s2918_s24 + $0x1d0] sm:$0xff]  ;;  %v1152_v4 = vld [vmem:[%s2918_s24 + $0x1d8] sm:$0xff] }
 0x178   : > { %1020 = vmax.xlane.f32.xlu0 %v2901_v63  ;;  %v1122_v62 = vld [vmem:[%s2918_s24 + $0xe8] sm:$0xff] }
 0x179   : > { %2345 = vmatpush3.bf16.msra.mxu0 %v2344_v61  ;;  %v2389_v61 = vpack.c.bf16 %v1138_v58, %v1137_v57 }
 0x17a   : > { %v760_v0 = vpop.f32.mrb[0].mxu1  ;;  %2370 = vmatprep.subr.bf16.mxu0 %v2587_v1 }
 0x17b   : > { %v1983_v2 = vpop.f32.mrb[1].mxu1  ;;  %v2904_v3 = vsel %vm1011_vm4, %v760_v0, -1e+30  ;;  %v2365_v0 = vpack.c.bf16 %v1122_v62, %v1121_v60  ;;  %v2410_v62 = vpack.c.bf16 %v1152_v4, %v1151_v59 }
 0x17c   : > { %1022 = vmax.xlane.f32.xlu1 %v2904_v3  ;;  %v1123_v2 = vld [vmem:[%s2918_s24 + $0xf0] sm:$0xff] }
 0x17d   : > { %2366 = vmatpush3.bf16.msra.mxu1 %v2365_v0  ;;  %v1139_v0 = vld [vmem:[%s2918_s24 + $0x170] sm:$0xff] }
 0x17e   : > { %2367 = vmatprep.subr.bf16.mxu1 %v2587_v1 }
 0x1b6   : > { %v881_v5 = vpop.f32.mrb[2].mxu0 }
 0x1b7   : > { %v2018_v6 = vpop.f32.mrb[3].mxu0  ;;  %v2907_v7 = vsel %vm1011_vm4, %v881_v5, -1e+30  ;;  %v1124_v5 = vld [vmem:[%s2918_s24 + $0xf8] sm:$0xff] }
 0x1b8   : > { %1024 = vmax.xlane.f32.xlu0 %v2907_v7  ;;  %v2368_v6 = vpack.c.bf16 %v1124_v5, %v1123_v2  ;;  %v1140_v2 = vld [vmem:[%s2918_s24 + $0x178] sm:$0xff]  ;;  %v1153_v5 = vld [vmem:[%s2918_s24 + $0x1e0] sm:$0xff] }
 0x1ba   : > { %v1002_v8 = vpop.f32.mrb[2].mxu1  ;;  %2369 = vmatpush3.bf16.msra.mxu1 %v2368_v6  ;;  %v1154_v6 = vld [vmem:[%s2918_s24 + $0x1e8] sm:$0xff] }
 0x1bb   : > { %v2053_v9 = vpop.f32.mrb[3].mxu1  ;;  %v2910_v10 = vsel %vm1011_vm4, %v1002_v8, -1e+30  ;;  %2394 = vmatprep.subr.bf16.mxu1 %v2587_v1  ;;  %v2988_v8 = vld [vmem:[#allocation3 + $0x10] sm:$0xff] }
 0x1bc   : > { %1026 = vmax.xlane.f32.xlu0 %v2910_v10 }
 0x205   : > { %v1021_v40 = vpop.xlane.xlu0 %1020 }
 0x206   : > { %v2950_v41 = vmax.f32 %v2947_v39, %v1021_v40  ;;  %v1145_v40 = vld [vmem:[%s2918_s24 + $0x1a0] sm:$0xff] }
 0x207   : > { %v2401_v46 = vpack.c.bf16 %v1146_v44, %v1145_v40 }
 0x208   : > { %v1032_v43 = vsub.f32 %v2947_v39, %v2950_v41  ;;  %1473 = vst.msk [vmem:[#allocation3] sm:$0xff] %vm440_vm3, %v2950_v41  ;;  %1042 = vperm.xlu1 %2481, %v2950_v41   ;;  %v1135_v39 = vld [vmem:[%s2918_s24 + $0x150] sm:$0xff]  ;;  %v1136_v41 = vld [vmem:[%s2918_s24 + $0x158] sm:$0xff] }
 0x209   : > { %v1023_v47 = vpop.xlane.xlu1 %1022  ;;  %v2386_v55 = vpack.c.bf16 %v1136_v41, %v1135_v39  ;;  %v1439_v39 = vld [vmem:[#allocation5 + $0x10] sm:$0xff] }
 0x20a   : > { %v2964_v50 = vmax.f32 %v2952_v42, %v1023_v47  ;;  %v1133_v47 = vld [vmem:[%s2918_s24 + $0x140] sm:$0xff] }
 0x20b   : > { %v2383_v51 = vpack.c.bf16 %v1134_v48, %v1133_v47 }
 0x20c   : > { %v1033_v52 = vsub.f32 %v2952_v42, %v2964_v50  ;;  %1474 = vst.msk [vmem:[#allocation3 + $0x8] sm:$0xff] %vm440_vm3, %v2964_v50  ;;  %1047 = vperm.xlu0 %2480, %v2964_v50   ;;  %v1070_v42 = vld [vmem:[#allocation4 + $0x10] sm:$0xff] }
 0x245   : > { %v1025_v9 = vpop.xlane.xlu0 %1024 }
 0x246   : > { %v2991_v11 = vmax.f32 %v2988_v8, %v1025_v9  ;;  %v2392_v9 = vpack.c.bf16 %v1140_v2, %v1139_v0 }
 0x248   : > { %v1034_v13 = vsub.f32 %v2988_v8, %v2991_v11  ;;  %1475 = vst.msk [vmem:[#allocation3 + $0x10] sm:$0xff] %vm440_vm3, %v2991_v11  ;;  %1052 = vperm.xlu1 %2481, %v2991_v11   ;;  %v2413_v11 = vpack.c.bf16 %v1154_v6, %v1153_v5 }
 0x249   : > { %v1027_v14 = vpop.xlane.xlu0 %1026 }
 0x24a   : > { %v3001_v15 = vmax.f32 %v2993_v12, %v1027_v14 }
 0x24c   : > { %v1035_v16 = vsub.f32 %v2993_v12, %v3001_v15  ;;  %1476 = vst.msk [vmem:[#allocation3 + $0x18] sm:$0xff] %vm440_vm3, %v3001_v15  ;;  %1057 = vperm.xlu1 %2481, %v3001_v15   ;;  %v1155_v12 = vld [vmem:[%s2918_s24 + $0x1f0] sm:$0xff] }
 0x287   : > { %v1043_v17 = vpop.permute.xlu1 %1042 }
 0x288   : > { %v1060_v19 = vsub.f32 %v2901_v63, %v1043_v17  ;;  %v2374_v63 = vpack.c.bf16 %v1128_v26, %v1127_v25  ;;  %v1069_v25 = vld [vmem:[#allocation4 + $0x8] sm:$0xff] }
 0x28a   : > { %2482 = vpow2.f32 %v1060_v19 }
 0x28b   : > { %v1048_v20 = vpop.permute.xlu0 %1047 }
 0x28c   : > { %v1061_v21 = vsub.f32 %v2904_v3, %v1048_v20  ;;  %v1130_v3 = vld [vmem:[%s2918_s24 + $0x128] sm:$0xff] }
 0x28d   : > { %v2377_v35 = vpack.c.bf16 %v1130_v3, %v1129_v31  ;;  %v1437_v3 = vld [vmem:[#allocation5] sm:$0xff] }
 0x28e   : > { %2484 = vpow2.f32 %v1061_v21 }
 0x28f   : > { %2486 = vpow2.f32 %v1032_v43  ;;  %v1149_v43 = vld [vmem:[%s2918_s24 + $0x1c0] sm:$0xff] }
 0x290   : > { %2488 = vpow2.f32 %v1034_v13  ;;  %v2407_v56 = vpack.c.bf16 %v1150_v54, %v1149_v43  ;;  %v1156_v13 = vld [vmem:[%s2918_s24 + $0x1f8] sm:$0xff] }
 0x291   : > { %2490 = vpow2.f32 %v1035_v16  ;;  %v2416_v15 = vpack.c.bf16 %v1156_v13, %v1155_v12  ;;  %v1440_v43 = vld [vmem:[#allocation5 + $0x18] sm:$0xff] }
 0x294   : > { %v2483_v29 = vpop.eup %2482 }
 0x295   : > { %1076 = vadd.xlane.f32.xlu0 %v2483_v29  ;;  %2087 = vmatmul.mubr.f32.vlgmr.msra.gmra.mrb[4].mxu0 %v2483_v29 }
 0x296   : > { %2372 = vmatpush3.bf16.msra.mxu0 %v2371_v24  ;;  %2156 = vmatprep.mubr.msk.f32.mxu0 %vm2588_vm2, %v2589_v18 }
 0x297   : > { %2373 = vmatprep.subr.bf16.mxu0 %v2587_v1 }
 0x298   : > { %v2485_v34 = vpop.eup %2484 }
 0x299   : > { %1078 = vadd.xlane.f32.xlu1 %v2485_v34  ;;  %2122 = vmatmul.mubr.f32.vlgmr.msra.gmra.mrb[4].mxu1 %v2485_v34  ;;  %v2487_v60 = vpop.eup %2486 }
 0x29a   : > { %2375 = vmatpush3.bf16.msra.mxu0 %v2374_v63  ;;  %2396 = vmatpush3.bf16.msra.mxu1 %v2395_v30  ;;  %v2489_v8 = vpop.eup %2488  ;;  %v1072_v24 = vmul.f32 %v2487_v60, %v1068_v23  ;;  %v1071_v30 = vld [vmem:[#allocation4 + $0x18] sm:$0xff] }
 0x29b   : > { %2376 = vmatprep.subr.bf16.mxu0 %v2587_v1  ;;  %2397 = vmatprep.subr.bf16.mxu1 %v2587_v1  ;;  %v2491_v14 = vpop.eup %2490  ;;  %v1074_v50 = vmul.f32 %v2489_v8, %v1070_v42 }
 0x29c   : > { %2191 = vmatprep.mubr.msk.f32.mxu1 %vm2588_vm2, %v2589_v18  ;;  %v1148_v18 = vld [vmem:[%s2918_s24 + $0x1b8] sm:$0xff]  ;;  %v1075_v33 = vmul.f32 %v2491_v14, %v1071_v30 }
 0x29d   : > { %v2404_v53 = vpack.c.bf16 %v1148_v18, %v1147_v49 }
 0x29e   : > { %2378 = vmatpush3.bf16.msra.mxu0 %v2377_v35  ;;  %2399 = vmatpush3.bf16.msra.mxu1 %v2398_v36 }
 0x29f   : > { %2379 = vmatprep.subr.bf16.mxu0 %v2587_v1  ;;  %2400 = vmatprep.subr.bf16.mxu1 %v2587_v1 }
 0x2a2   : > { %2381 = vmatpush3.bf16.msra.mxu0 %v2380_v45  ;;  %2402 = vmatpush3.bf16.msra.mxu1 %v2401_v46  ;;  %v1438_v46 = vld [vmem:[#allocation5 + $0x8] sm:$0xff] }
 0x2a3   : > { %2382 = vmatprep.subr.bf16.mxu0 %v2587_v1  ;;  %2403 = vmatprep.subr.bf16.mxu1 %v2587_v1 }
 0x2a6   : > { %2384 = vmatpush3.bf16.msra.mxu0 %v2383_v51  ;;  %2405 = vmatpush3.bf16.msra.mxu1 %v2404_v53 }
 0x2a7   : > { %2385 = vmatprep.subr.bf16.mxu0 %v2587_v1  ;;  %2406 = vmatprep.subr.bf16.mxu1 %v2587_v1 }
 0x2aa   : > { %1443 = vperm.xlu1 %2481, %v2487_v60   ;;  %2387 = vmatpush3.bf16.msra.mxu0 %v2386_v55 }
 0x2ab   : > { %2408 = vmatpush3.bf16.msra.mxu1 %v2407_v56  ;;  %2388 = vmatprep.subr.bf16.mxu0 %v2587_v1 }
 0x2ac   : > { %2409 = vmatprep.subr.bf16.mxu1 %v2587_v1 }
 0x2ae   : > { %1453 = vperm.xlu1 %2481, %v2489_v8   ;;  %2390 = vmatpush3.bf16.msra.mxu0 %v2389_v61 }
 0x2af   : > { %2411 = vmatpush3.bf16.msra.mxu1 %v2410_v62  ;;  %2391 = vmatprep.subr.bf16.mxu0 %v2587_v1 }
 0x2b0   : > { %2412 = vmatprep.subr.bf16.mxu1 %v2587_v1 }
 0x2b2   : > { %1458 = vperm.xlu1 %2481, %v2491_v14   ;;  %2393 = vmatpush3.bf16.msra.mxu0 %v2392_v9 }
 0x2b3   : > { %2414 = vmatpush3.bf16.msra.mxu1 %v2413_v11 }
 0x2b4   : > { %2415 = vmatprep.subr.bf16.mxu1 %v2587_v1 }
 0x2b7   : > { %2417 = vmatpush3.bf16.msra.mxu1 %v2416_v15 }
 0x2c7   : > { %v1053_v16 = vpop.permute.xlu1 %1052 }
 0x2c8   : > { %v1062_v17 = vsub.f32 %v2907_v7, %v1053_v16 }
 0x2ca   : > { %2492 = vpow2.f32 %v1062_v17 }
 0x2cb   : > { %v1058_v19 = vpop.permute.xlu1 %1057 }
 0x2cc   : > { %v1063_v20 = vsub.f32 %v2910_v10, %v1058_v19 }
 0x2ce   : > { %2494 = vpow2.f32 %v1063_v20 }
 0x2cf   : > { %2496 = vpow2.f32 %v1033_v52 }
 0x2d4   : > { %v2493_v21 = vpop.eup %2492 }
 0x2d5   : > { %1080 = vadd.xlane.f32.xlu0 %v2493_v21  ;;  %2157 = vmatmul.mubr.f32.vlgmr.msra.gmra.mrb[6].mxu0 %v2493_v21 }
 0x2d8   : > { %v2495_v22 = vpop.eup %2494 }
 0x2d9   : > { %1082 = vadd.xlane.f32.xlu0 %v2495_v22  ;;  %2192 = vmatmul.mubr.f32.vlgmr.msra.gmra.mrb[6].mxu1 %v2495_v22  ;;  %v2497_v1 = vpop.eup %2496 }
 0x2da   : > { %v1073_v10 = vmul.f32 %v2497_v1, %v1069_v25 }
 0x2ef   : > { %1448 = vperm.xlu0 %2480, %v2497_v1  }
 0x322   : > { %v1077_v7 = vpop.xlane.xlu0 %1076 }
 0x323   : > { %v1084_v26 = vadd.f32 %v1077_v7, %v1072_v24 }
 0x325   : > { %1089 = vst.msk [vmem:[#allocation4] sm:$0xff] %vm440_vm3, %v1084_v26 }
 0x326   : > { %v1079_v27 = vpop.xlane.xlu1 %1078 }
 0x327   : > { %v1085_v28 = vadd.f32 %v1079_v27, %v1073_v10 }
 0x329   : > { %1090 = vst.msk [vmem:[#allocation4 + $0x8] sm:$0xff] %vm440_vm3, %v1085_v28 }
 0x32a   : > { %v1444_v32 = vpop.permute.xlu1 %1443 }
 0x32b   : > { %v1461_v35 = vmul.f32 %v1444_v32, %v1437_v3 }
 0x32c   : > { %v1484_v29 = vld [vmem:[#allocation4] sm:$0xff] }
 0x32d   : > { %1490 = vperm.xlu0 %2480, %v1484_v29  }
 0x32e   : > { %v1454_v53 = vpop.permute.xlu1 %1453 }
 0x32f   : > { %v1463_v41 = vmul.f32 %v1454_v53, %v1439_v39 }
 0x330   : > { %v1485_v63 = vld [vmem:[#allocation4 + $0x8] sm:$0xff] }
 0x331   : > { %1495 = vperm.xlu1 %2481, %v1485_v63  }
 0x332   : > { %v1459_v54 = vpop.permute.xlu1 %1458 }
 0x333   : > { %v1464_v58 = vmul.f32 %v1459_v54, %v1440_v43 }
 0x362   : > { %v1081_v52 = vpop.xlane.xlu0 %1080 }
 0x363   : > { %v1086_v31 = vadd.f32 %v1081_v52, %v1074_v50 }
 0x365   : > { %1091 = vst.msk [vmem:[#allocation4 + $0x10] sm:$0xff] %vm440_vm3, %v1086_v31 }
 0x366   : > { %v1083_v34 = vpop.xlane.xlu0 %1082 }
 0x367   : > { %v1087_v36 = vadd.f32 %v1083_v34, %v1075_v33 }
 0x368   : > { %v1223_v37 = vpop.f32.mrb[4].mxu0 }
 0x369   : > { %1092 = vst.msk [vmem:[#allocation4 + $0x18] sm:$0xff] %vm440_vm3, %v1087_v36  ;;  %v1465_v38 = vadd.f32 %v1461_v35, %v1223_v37  ;;  %v2088_v40 = vpop.f32.mrb[5].mxu0 }
 0x36b   : > { %1469 = vst.msk [vmem:[#allocation5] sm:$0xff] %vm435_vm0, %v1465_v38 }
 0x36c   : > { %v1293_v44 = vpop.f32.mrb[4].mxu1  ;;  %v1486_v45 = vld [vmem:[#allocation4 + $0x10] sm:$0xff] }
 0x36d   : > { %1500 = vperm.xlu0 %2480, %v1486_v45   ;;  %v2123_v47 = vpop.f32.mrb[5].mxu1 }
 0x36e   : > { %v1449_v48 = vpop.permute.xlu0 %1448 }
 0x36f   : > { %v1462_v49 = vmul.f32 %v1449_v48, %v1438_v46 }
 0x370   : > { %v1487_v18 = vld [vmem:[#allocation4 + $0x18] sm:$0xff] }
 0x371   : > { %v1466_v51 = vadd.f32 %v1462_v49, %v1293_v44  ;;  %1505 = vperm.xlu1 %2481, %v1487_v18  }
 0x372   : > { %v1480_v2 = vld [vmem:[#allocation5] sm:$0xff] }
 0x373   : > { %1470 = vst.msk [vmem:[#allocation5 + $0x8] sm:$0xff] %vm435_vm0, %v1466_v51 }
 0x37a   : > { %v1481_v8 = vld [vmem:[#allocation5 + $0x8] sm:$0xff] }
 0x3a8   : > { %v1363_v55 = vpop.f32.mrb[6].mxu0 }
 0x3a9   : > { %v1467_v56 = vadd.f32 %v1463_v41, %v1363_v55  ;;  %v2158_v57 = vpop.f32.mrb[7].mxu0 }
 0x3ab   : > { %1471 = vst.msk [vmem:[#allocation5 + $0x10] sm:$0xff] %vm435_vm0, %v1467_v56 }
 0x3ac   : > { %v1433_v59 = vpop.f32.mrb[6].mxu1  ;;  %v1491_v4 = vpop.permute.xlu0 %1490 }
 0x3ad   : > { %v1468_v60 = vadd.f32 %v1464_v58, %v1433_v59  ;;  %v2193_v61 = vpop.f32.mrb[7].mxu1  ;;  %2498 = vrcp.f32 %v1491_v4 }
 0x3af   : > { %1472 = vst.msk [vmem:[#allocation5 + $0x18] sm:$0xff] %vm435_vm0, %v1468_v60 }
 0x3b0   : > { %v1496_v62 = vpop.permute.xlu1 %1495 }
 0x3b1   : > { %2500 = vrcp.f32 %v1496_v62 }
 0x3b2   : > { %v1482_v14 = vld [vmem:[#allocation5 + $0x10] sm:$0xff] }
 0x3b6   : > { %v1483_v17 = vld [vmem:[#allocation5 + $0x18] sm:$0xff] }
 0x3b7   : > { %v2499_v0 = vpop.eup %2498 }
 0x3b8   : > { %v1509_v5 = vmul.f32 %v2499_v0, %v1480_v2 }
 0x3ba   : > { %1516 = vst.msk [vmem:[%s331_s30] sm:$0xff] %vm435_vm0, %v1509_v5 }
 0x3bb   : > { %v2501_v6 = vpop.eup %2500 }
 0x3bc   : > { %v1511_v9 = vmul.f32 %v2501_v6, %v1481_v8 }
 0x3be   : > { %1517 = vst.msk [vmem:[%s331_s30 + $0x8] sm:$0xff] %vm435_vm0, %v1511_v9 }
 0x3ec   : > { %v1501_v11 = vpop.permute.xlu0 %1500 }
 0x3ed   : > { %2502 = vrcp.f32 %v1501_v11 }
 0x3f0   : > { %v1506_v12 = vpop.permute.xlu1 %1505 }
 0x3f1   : > { %2504 = vrcp.f32 %v1506_v12 }
 0x3f7   : > { %v2503_v13 = vpop.eup %2502 }
 0x3f8   : > { %v1513_v15 = vmul.f32 %v2503_v13, %v1482_v14 }
 0x3fa   : > { %1518 = vst.msk [vmem:[%s331_s30 + $0x10] sm:$0xff] %vm435_vm0, %v1513_v15 }
 0x3fb   : > { %v2505_v16 = vpop.eup %2504 }
 0x3fc   : > { %v1515_v19 = vmul.f32 %v2505_v16, %v1483_v17 }
 0x3fe   : > { %1519 = vst.msk [vmem:[%s331_s30 + $0x18] sm:$0xff] %vm435_vm0, %v1515_v19 }
 0x3ff   : > { %2519 = shalt.err (!%p2516_p5)
}
 0x400   : > { %s2520_s14 = scalar_lea.hbm %s3087_s9, 512  ;;  %s2524_s24 = scalar_lea.hbm %s3142_s4, 1024 }
 0x401   : > { %p2521_p6 = scmp.ne.s32.totalorder %s3087_s9, %s2520_s14  ;;  %p2525_p10 = scmp.lt.u32.totalorder %s3087_s9, %s3142_s4 }
 0x402   : > { %p2526_p11 = scmp.lt.u32.totalorder %s2524_s24, %s2520_s14  ;;  %p2528_p13 = scmp.lt.u32.totalorder %s2520_s14, %s3087_s9 }
 0x403   : > { %p2522_p7 = pnand %p2521_p6, %p2659_p4 }
 0x404   : > { %p2527_p12 = por %p2526_p11, %p2525_p10 }
 0x405   : > { %p2523_p9 = pneg %p2522_p7 }
 0x406   : > { %p2529_p0 = por %p2528_p13, %p2527_p12 }
 0x408   : > { %p2530_p1 = pnand %p2529_p0, %p2523_p9 }
 0x40a   : > { %2533 = shalt.err (!%p2530_p1)
}
 0x40b   : > { %s2592_s30 = smov 128   ;;  %s2593_s5 = smov 8  }
 0x40c   : > { %2418 = dma.vmem_to_hbm [thread:$0]  (%p2659_p4), %s3089_s6, 512, %s3087_s9, %s3092_s10, %s2592_s30, %s2592_s30, %s2593_s5  }
 0x40d PF: > { %p2424_p2 = scmp.ge.s32.totalorder %s2584_s20, 2  ;;  %s1552_s7 = sand.u32 1, %s2564_s15  }
 0x40e   : > { %s1553_s8 = scalar_lea.sflag [#allocation7], %s1552_s7 }
 0x40f   : > { %p2421_p3 = pnand %p2424_p2, %p2666_p8 }
 0x411   : > { %2559 = dma.done.wait (!%p2421_p3), %s1553_s8, 512  }
 0x412   : > { %2561 = vsyncadd (!%p2421_p3), %s1553_s8, 4294966784  ;;  %s17_s20 = sadd.s32 1, %s2584_s20   ;;  %s3147_s15 = smov %s2568_s16 }
 0x413   : > { %p14_p5 = scmp.ge.s32.totalorder %s17_s20, 4   ;;  %s3148_s16 = smov %s2572_s17 }
 0x414   : > { %s3149_s17 = smov %s2672_s28  ;;  %s3150_s18 = smov %s2580_s19 }
 0x415   : > { %s3151_s19 = smov %s3153_s23  ;;  %16 = sbr.rel (!%p14_p5) target bundleno = 4 (0x4), region = 88 }
 0x41c   :  { %1558 = vsyncpa [#allocation7], 1 }
 0x41d   :  { %1560 = vsyncpa [#allocation7 + $0x1], 1 }

</bundles_post_ra>
